<compile_context>
chip_gen: v5e
topology: v5e:2x2
jax: 0.10.0
libtpu: 0.0.40
codegen_flags: <defaults>
</compile_context>

<pallas_src>
import functools

import jax
import jax.numpy as jnp
from jax.experimental import pallas as pl
from jax.experimental.pallas import tpu as pltpu


# ----------------------------------------------------------------------------
# Generation-aware scoped-VMEM limit and tile selection helpers.
# ----------------------------------------------------------------------------
def _vmem_limit_bytes():
    try:
        info = pltpu.get_tpu_info()
        cap = int(getattr(info, "vmem_capacity_bytes", 0)) or (64 << 20)
    except Exception:
        cap = 64 << 20          # conservative fallback (v7x physical VMEM)
    # ~80% of physical: ~102 MiB on v5e/v6e (128 MiB), ~51 MiB on v7x (64 MiB).
    return max(32 << 20, int(cap * 0.8))


_VMEM_LIMIT = _vmem_limit_bytes()


def _pick_tile(n, cap, align):
    """Largest divisor of n that is <= cap, preferring multiples of `align`.

    If n <= cap the full dimension is returned (always layout-legal).  If n >
    cap and no aligned divisor exists, the largest divisor is returned (rare;
    may cost masked stores).
    """
    cap = min(n, cap)
    best = None
    for d in range(cap, 0, -1):
        if n % d == 0:
            if d % align == 0:
                return d
            if best is None:
                best = d
    return best if best is not None else n


# ----------------------------------------------------------------------------
# Kernel 0: fused QKV projection (bf16 weights, f32 accumulate).
#   Output shape (3, N, C) so kernel 1 can address q / k / v with clean
#   BlockSpecs (no sub-128 lane slicing).
# ----------------------------------------------------------------------------
def qkv_proj_kernel(x_ref, w_ref, qkv_ref):
    xb = x_ref[...].astype(jnp.bfloat16)                         # (tile_n, C)
    qkv_ref[0] = jnp.dot(xb, w_ref[0],                           # bf16 MXU
                         preferred_element_type=jnp.float32)


def qkv_proj_pallas(x_flat, wqkv):
    N, C = x_flat.shape
    tile_n = _pick_tile(N, 256, 8)
    # TODO(synk): at very large C, also tile the (C, C) weight block along its
    # output columns so a single weight block stays well inside VMEM.
    return pl.pallas_call(
        qkv_proj_kernel,
        out_shape=jax.ShapeDtypeStruct((3, N, C), jnp.float32),
        grid=(N // tile_n, 3),
        in_specs=[
            pl.BlockSpec((tile_n, C), lambda i, j: (i, 0)),
            pl.BlockSpec((1, C, C), lambda i, j: (j, 0, 0)),
        ],
        out_specs=pl.BlockSpec((1, tile_n, C), lambda i, j: (j, i, 0)),
        compiler_params=pltpu.CompilerParams(
            dimension_semantics=("parallel", "parallel"),
            vmem_limit_bytes=_VMEM_LIMIT),
    )(x_flat, wqkv)


# ----------------------------------------------------------------------------
# Kernel 1: flash-style causal attention over (B, q_tiles, kv_tiles) with an
#           online-softmax VMEM accumulator; epilogue on the last KV step does
#           Wo projection -> residual + LayerNorm1 -> router logits.
# ----------------------------------------------------------------------------
def flash_ln1_router_kernel(x_ref, q_ref, k_ref, v_ref, wo_ref, bo_ref,
                            g1_ref, b1_ref, wr_ref, br_ref,
                            x1_ref, logit_ref, m_sc, l_sc, acc_sc,
                            *, n_heads, tq, tk):
    qi = pl.program_id(1)
    ki = pl.program_id(2)
    n_kv = pl.num_programs(2)
    C = x_ref.shape[-1]
    dh = C // n_heads
    scale = 1.0 / (dh ** 0.5)

    @pl.when(ki == 0)
    def _():
        m_sc[...] = jnp.full(m_sc.shape, -1e30, m_sc.dtype)
        l_sc[...] = jnp.zeros(l_sc.shape, l_sc.dtype)
        acc_sc[...] = jnp.zeros(acc_sc.shape, acc_sc.dtype)

    # Causal: a KV tile strictly above the diagonal contributes exactly zero
    # (its probabilities underflow to 0), so skip its compute entirely.
    @pl.when(ki * tk <= qi * tq + (tq - 1))
    def _():
        # Per-tile head split.  TODO(synk): express the batched-head
        # contractions with lax.dot_general dimension_numbers to drop these
        # small per-tile transposes once verified relayout-free in MLIR.
        q = q_ref[0, 0].reshape(tq, n_heads, dh).transpose(1, 0, 2)   # (H,tq,dh)
        k = k_ref[0, 0].reshape(tk, n_heads, dh).transpose(1, 0, 2)   # (H,tk,dh)
        v = v_ref[0, 0].reshape(tk, n_heads, dh).transpose(1, 0, 2)

        s = jnp.einsum("hqd,hkd->hqk",
                       q.astype(jnp.bfloat16), k.astype(jnp.bfloat16),
                       preferred_element_type=jnp.float32) * scale    # (H,tq,tk)
        row = qi * tq + jax.lax.broadcasted_iota(jnp.int32, (tq, tk), 0)
        col = ki * tk + jax.lax.broadcasted_iota(jnp.int32, (tq, tk), 1)
        s = jnp.where((row >= col)[None, :, :], s, -1e30)

        m_prev = m_sc[...]
        m_new = jnp.maximum(m_prev, jnp.max(s, axis=-1, keepdims=True))
        alpha = jnp.exp(m_prev - m_new)
        p = jnp.exp(s - m_new)                                        # f32 EUP
        l_sc[...] = alpha * l_sc[...] + jnp.sum(p, axis=-1, keepdims=True)
        acc_sc[...] = alpha * acc_sc[...] + jnp.einsum(
            "hqk,hkd->hqd", p.astype(jnp.bfloat16), v.astype(jnp.bfloat16),
            preferred_element_type=jnp.float32)
        m_sc[...] = m_new

    # Epilogue: Wo proj + residual + LN1 + router logits for this query tile.
    @pl.when(ki == n_kv - 1)
    def _():
        o = acc_sc[...] / l_sc[...]                                   # exact divide
        o = o.transpose(1, 0, 2).reshape(tq, C)                       # (tq, C)
        att = jnp.dot(o.astype(jnp.bfloat16), wo_ref[...],
                      preferred_element_type=jnp.float32) + bo_ref[...]
        s_res = x_ref[0] + att
        mu = jnp.mean(s_res, axis=-1, keepdims=True)
        var = jnp.mean((s_res - mu) ** 2, axis=-1, keepdims=True)
        x1 = (s_res - mu) * jax.lax.rsqrt(var + 1e-5) * g1_ref[...] + b1_ref[...]
        x1_ref[0] = x1
        # Lane-dense router logits (E padded up to 128 in wr/br).
        logit_ref[0] = jnp.dot(x1.astype(jnp.bfloat16), wr_ref[...],
                               preferred_element_type=jnp.float32) + br_ref[...]


def flash_ln1_router_pallas(x, qkv, wo, bo, ln1_g, ln1_b, wr_p, br_p, n_heads):
    B, T, C = x.shape
    Ep = wr_p.shape[1]
    dh = C // n_heads
    assert dh * n_heads == C
    tq = _pick_tile(T, 256, 8)
    tk = _pick_tile(T, 512, 8)
    kern = functools.partial(flash_ln1_router_kernel,
                             n_heads=n_heads, tq=tq, tk=tk)
    return pl.pallas_call(
        kern,
        out_shape=(jax.ShapeDtypeStruct((B, T, C), jnp.float32),
                   jax.ShapeDtypeStruct((B, T, Ep), jnp.float32)),
        grid=(B, T // tq, T // tk),
        in_specs=[
            pl.BlockSpec((1, tq, C), lambda b, qi, ki: (b, qi, 0)),        # x (residual)
            pl.BlockSpec((1, 1, tq, C), lambda b, qi, ki: (0, b, qi, 0)),  # q
            pl.BlockSpec((1, 1, tk, C), lambda b, qi, ki: (1, b, ki, 0)),  # k
            pl.BlockSpec((1, 1, tk, C), lambda b, qi, ki: (2, b, ki, 0)),  # v
            pl.BlockSpec((C, C), lambda b, qi, ki: (0, 0)),                # wo (bf16)
            pl.BlockSpec((1, C), lambda b, qi, ki: (0, 0)),                # bo
            pl.BlockSpec((1, C), lambda b, qi, ki: (0, 0)),                # ln1_g
            pl.BlockSpec((1, C), lambda b, qi, ki: (0, 0)),                # ln1_b
            pl.BlockSpec((C, Ep), lambda b, qi, ki: (0, 0)),               # wr (padded)
            pl.BlockSpec((1, Ep), lambda b, qi, ki: (0, 0)),               # br (padded)
        ],
        out_specs=(pl.BlockSpec((1, tq, C), lambda b, qi, ki: (b, qi, 0)),
                   pl.BlockSpec((1, tq, Ep), lambda b, qi, ki: (b, qi, 0))),
        scratch_shapes=[
            pltpu.VMEM((n_heads, tq, 1), jnp.float32),   # running max
            pltpu.VMEM((n_heads, tq, 1), jnp.float32),   # running denom
            pltpu.VMEM((n_heads, tq, dh), jnp.float32),  # output accumulator
        ],
        compiler_params=pltpu.CompilerParams(
            dimension_semantics=("parallel", "parallel", "arbitrary"),
            vmem_limit_bytes=_VMEM_LIMIT),
    )(x, qkv, qkv, qkv, wo, bo, ln1_g, ln1_b, wr_p, br_p)


# ----------------------------------------------------------------------------
# Kernel 2: MoE expert FFN over (token_tiles, experts, Hd_tiles), accumulating
#           directly into the resident output block; residual + LayerNorm2
#           epilogue on the last reduction step.  Gates are lane-dense (E,1,N);
#           gate==0 off the top-k, so the dense weighted sum == sparse dispatch.
# ----------------------------------------------------------------------------
def moe_ln2_kernel(x1_ref, gate_ref, w1_ref, b1_ref, w2_ref, b2_ref,
                   g2_ref, be2_ref, o_ref):
    e_i = pl.program_id(1)
    h_i = pl.program_id(2)
    n_e = pl.num_programs(1)
    n_h = pl.num_programs(2)

    @pl.when(jnp.logical_and(e_i == 0, h_i == 0))
    def _():
        o_ref[...] = jnp.zeros(o_ref.shape, o_ref.dtype)

    xb = x1_ref[...].astype(jnp.bfloat16)                    # (tile_n, C)
    g = jnp.transpose(gate_ref[0], (1, 0))                   # (1,tile_n)->(tile_n,1)

    # Partial expert FFN over this Hd chunk: ReLU is elementwise in Hd and the
    # second matmul contracts over Hd, so summing chunk contributions is exact.
    hid = jnp.maximum(
        jnp.dot(xb, w1_ref[0], preferred_element_type=jnp.float32) + b1_ref[0],
        0.0)                                                 # (tile_n, tile_hd)
    y = jnp.dot(hid.astype(jnp.bfloat16), w2_ref[0],
                preferred_element_type=jnp.float32)          # (tile_n, C)
    o_ref[...] += g * y

    # Second-layer bias exactly once per expert (first Hd chunk), gate-weighted.
    @pl.when(h_i == 0)
    def _():
        o_ref[...] += g * b2_ref[0]

    # Fused residual + LayerNorm2 epilogue after the last expert / Hd chunk.
    @pl.when(jnp.logical_and(e_i == n_e - 1, h_i == n_h - 1))
    def _():
        s = x1_ref[...] + o_ref[...]
        mu = jnp.mean(s, axis=-1, keepdims=True)
        var = jnp.mean((s - mu) ** 2, axis=-1, keepdims=True)
        o_ref[...] = ((s - mu) * jax.lax.rsqrt(var + 1e-5)) * g2_ref[...] + be2_ref[...]


def moe_ln2_pallas(x1, gates, w1, b1, w2, b2, ln2_g, ln2_b):
    B, T, C = x1.shape
    N = B * T
    E, _, Hd = w1.shape

    # Token tile (parallel axis).  512 keeps kernel 2 weight-stream intensity
    # high on v5e/v6e; hidden tile 512 with bf16 expert weights keeps the
    # double-buffered per-expert weight blocks inside v7x's 64 MiB VMEM.
    tile_n = _pick_tile(N, 512, 128)
    tile_hd = _pick_tile(Hd, 512, 128)

    xf = x1.reshape(N, C)
    gt = jnp.transpose(gates.reshape(N, E), (1, 0)).reshape(E, 1, N)  # lane-dense

    # TODO(synk): for large E, switch to scalar-prefetch grouped dispatch
    # (PrefetchScalarGridSpec with per-expert token offsets) so only routed
    # tokens are processed instead of the dense all-experts sweep.
    # TODO(synk): consider pipeline_mode=pl.Buffered(3) on the w1/w2 specs if
    # the weight-stream DMA is exposed on v5e.
    out = pl.pallas_call(
        moe_ln2_kernel,
        out_shape=jax.ShapeDtypeStruct((N, C), jnp.float32),
        grid=(N // tile_n, E, Hd // tile_hd),
        in_specs=[
            pl.BlockSpec((tile_n, C), lambda i, e, h: (i, 0)),
            pl.BlockSpec((1, 1, tile_n), lambda i, e, h: (e, 0, i)),
            pl.BlockSpec((1, C, tile_hd), lambda i, e, h: (e, 0, h)),
            pl.BlockSpec((1, 1, tile_hd), lambda i, e, h: (e, 0, h)),
            pl.BlockSpec((1, tile_hd, C), lambda i, e, h: (e, h, 0)),
            pl.BlockSpec((1, 1, C), lambda i, e, h: (e, 0, 0)),
            pl.BlockSpec((1, C), lambda i, e, h: (0, 0)),
            pl.BlockSpec((1, C), lambda i, e, h: (0, 0)),
        ],
        out_specs=pl.BlockSpec((tile_n, C), lambda i, e, h: (i, 0)),
        compiler_params=pltpu.CompilerParams(
            dimension_semantics=("parallel", "arbitrary", "arbitrary"),
            vmem_limit_bytes=_VMEM_LIMIT),
    )(xf, gt, w1, b1, w2, b2, ln2_g, ln2_b)
    return out.reshape(B, T, C)


# ----------------------------------------------------------------------------
# Top-k gating + load-balancing loss (tiny O(B*T*E) glue, kept in plain JAX).
# ----------------------------------------------------------------------------
def router_gates(logits, top_k):
    E = logits.shape[-1]
    _, topi = jax.lax.top_k(logits, top_k)                               # (B,T,K)
    sel = jnp.sum(jax.nn.one_hot(topi, E, dtype=jnp.float32), axis=-2)   # (B,T,E)
    sparse_logits = jnp.where(sel > 0, logits, -jnp.inf)
    gates = jax.nn.softmax(sparse_logits, axis=-1)          # zero off the top-k
    full_probs = jax.nn.softmax(logits, axis=-1)
    density = jnp.mean(sel, axis=(0, 1))
    density_proxy = jnp.mean(full_probs, axis=(0, 1))
    lb_loss = E * jnp.sum(density * density_proxy)
    return gates, lb_loss


# ----------------------------------------------------------------------------
# Block forward
# ----------------------------------------------------------------------------
def block_forward(params, cfg, x, past_kv=None, use_cache=False):
    p = params
    B, T, C = x.shape
    E = cfg["num_experts"]

    # Kernel 0: QKV projection (q/k/v projected once, re-used by all q tiles).
    qkv = qkv_proj_pallas(x.reshape(B * T, C), p["wqkv"]).reshape(3, B, T, C)

    # Kernel 1: flash attention + Wo + residual + LN1 + router logits.
    x1, logits_p = flash_ln1_router_pallas(
        x, qkv, p["wo"], p["bo"], p["ln1_g"], p["ln1_b"],
        p["wr_p"], p["br_p"], cfg["n_heads"])
    logits = logits_p[..., :E]                       # drop lane padding

    # TODO(synk): past_kv / use_cache KV-cache path not exercised here (past_kv=None).
    next_kv = None

    gates, lb_loss = router_gates(logits, cfg["top_k"])

    # Kernel 2: gate-weighted expert FFN + residual + LN2.
    x2 = moe_ln2_pallas(x1, gates, p["w1"], p["b1"], p["w2"], p["b2"],
                        p["ln2_g"], p["ln2_b"])
    return x2, lb_loss, next_kv


# ----------------------------------------------------------------------------
# Deterministic parameter init (weights pre-transposed so y = x @ W + b).
# Matmul weights stored bf16 (f32 MXU accumulation in-kernel); biases / LN f32.
# ----------------------------------------------------------------------------
def init_params(key, n_embed, num_experts):
    C = n_embed
    Hd = 4 * C
    E = num_experts
    Ep = max(128, ((E + 127) // 128) * 128)          # lane-dense router width
    ks = jax.random.split(key, 8)

    def w(k, shape):
        return jax.random.normal(k, shape, jnp.float32) * 0.02

    wq, wk, wv = w(ks[0], (C, C)), w(ks[1], (C, C)), w(ks[2], (C, C))
    wr = w(ks[4], (C, E))
    wr_p = jnp.zeros((C, Ep), jnp.float32).at[:, :E].set(wr)

    return dict(
        wqkv=jnp.stack([wq, wk, wv], axis=0).astype(jnp.bfloat16),   # (3, C, C)
        wo=w(ks[3], (C, C)).astype(jnp.bfloat16),
        bo=jnp.zeros((1, C), jnp.float32),
        ln1_g=jnp.ones((1, C), jnp.float32),
        ln1_b=jnp.zeros((1, C), jnp.float32),
        ln2_g=jnp.ones((1, C), jnp.float32),
        ln2_b=jnp.zeros((1, C), jnp.float32),
        wr_p=wr_p.astype(jnp.bfloat16),
        br_p=jnp.zeros((1, Ep), jnp.float32),
        w1=w(ks[5], (E, C, Hd)).astype(jnp.bfloat16),
        b1=jnp.zeros((E, 1, Hd), jnp.float32),
        w2=w(ks[6], (E, Hd, C)).astype(jnp.bfloat16),
        b2=jnp.zeros((E, 1, C), jnp.float32),
    )


if __name__ == "__main__":
    B, T = 2, 8
    n_embed, n_heads, num_experts, top_k = 32, 4, 4, 2
    cfg = dict(n_heads=n_heads, top_k=top_k, num_experts=num_experts)

    key = jax.random.PRNGKey(0)
    kp, kx = jax.random.split(key)
    params = init_params(kp, n_embed, num_experts)
    x = jax.random.normal(kx, (B, T, n_embed), jnp.float32)

    out, lb_loss, next_kv = block_forward(params, cfg, x)
    jax.block_until_ready(out)
    jax.block_until_ready(lb_loss)

    assert out.shape == (B, T, n_embed)
    assert jnp.isfinite(out).all()
    assert jnp.isfinite(lb_loss)
    assert next_kv is None
    print("KERNEL_OK")
</pallas_src>

<mosaic_0001>
module attributes {stable_mosaic.version = 11 : i64} {
  func.func @qkv_proj_kernel(%arg0: i32, %arg1: i32, %arg2: memref<16x32xf32, #tpu.memory_space<vmem>>, %arg3: memref<1x32x32xbf16, #tpu.memory_space<vmem>>, %arg4: memref<1x16x32xf32, #tpu.memory_space<vmem>>) attributes {dimension_semantics = [#tpu.dimension_semantics<parallel>, #tpu.dimension_semantics<parallel>], iteration_bounds = array<i64: 1, 3>, scalar_prefetch = 0 : i64, scratch_operands = 0 : i64, tpu.core_type = #tpu.core_type<tc>, window_params = [{transform_indices = @transform_0, window_bounds = array<i64: 16, 32>}, {transform_indices = @transform_1, window_bounds = array<i64: 1, 32, 32>}, {transform_indices = @transform_2, window_bounds = array<i64: 1, 16, 32>}]} {
    %c0 = arith.constant 0 : index
    %c0_0 = arith.constant 0 : index
    %0 = vector.load %arg2[%c0, %c0_0] : memref<16x32xf32, #tpu.memory_space<vmem>>, vector<16x32xf32>
    %1 = arith.truncf %0 : vector<16x32xf32> to vector<16x32xbf16>
    %c0_1 = arith.constant 0 : index
    %c0_2 = arith.constant 0 : index
    %c0_3 = arith.constant 0 : index
    %2 = vector.load %arg3[%c0_1, %c0_2, %c0_3] : memref<1x32x32xbf16, #tpu.memory_space<vmem>>, vector<1x32x32xbf16>
    %3 = vector.shape_cast %2 : vector<1x32x32xbf16> to vector<32x32xbf16>
    %cst = arith.constant dense<0.000000e+00> : vector<16x32xf32>
    %4 = tpu.matmul %1, %3, %cst {dimension_numbers = #tpu.dot_dimension_numbers<[1], [0], [0], [1], [0, 0, 1, 1], [], []>} : vector<16x32xbf16>, vector<32x32xbf16>, vector<16x32xf32> -> vector<16x32xf32>
    %c0_4 = arith.constant 0 : index
    %c0_5 = arith.constant 0 : index
    %c0_6 = arith.constant 0 : index
    %5 = vector.load %arg4[%c0_4, %c0_5, %c0_6] : memref<1x16x32xf32, #tpu.memory_space<vmem>>, vector<1x16x32xf32>
    %6 = vector.shape_cast %5 : vector<1x16x32xf32> to vector<16x32xf32>
    %7 = vector.shape_cast %4 : vector<16x32xf32> to vector<1x16x32xf32>
    tpu.vector_store %arg4[%c0_4, %c0_5, %c0_6], %7 {strides = array<i32>} : memref<1x16x32xf32, #tpu.memory_space<vmem>>, vector<1x16x32xf32>,
    return
  }
  func.func @transform_0(%arg0: i32, %arg1: i32) -> (i32, i32) {
    %c0_i32 = arith.constant 0 : i32
    %c0_i32_0 = arith.constant 0 : i32
    return %arg0, %c0_i32 : i32, i32
  }
  func.func @transform_1(%arg0: i32, %arg1: i32) -> (i32, i32, i32) {
    %c0_i32 = arith.constant 0 : i32
    %c0_i32_0 = arith.constant 0 : i32
    %c0_i32_1 = arith.constant 0 : i32
    return %arg1, %c0_i32, %c0_i32_0 : i32, i32, i32
  }
  func.func @transform_2(%arg0: i32, %arg1: i32) -> (i32, i32, i32) {
    %c0_i32 = arith.constant 0 : i32
    %c0_i32_0 = arith.constant 0 : i32
    return %arg1, %arg0, %c0_i32 : i32, i32, i32
  }
}

</mosaic_0001>

<bundles_post_ra>
// kernel: tpu_custom_call.1
= control target key start
LH: loop header
LB: loop body
LE: loop exit
PB: predicated region body
PF: predicated region fallthrough
CT: control target
= control target key end

     0   :  { %7 = vsyncpa [#allocation3], 0  ;;  %s787_s0 = inlined_call_operand.hbm [shape: f32[16,32], index: 0, kind: input, shape index: {}]   ;;  %s788_s1 = inlined_call_operand.hbm [shape: bf16[3,32,32], index: 1, kind: input, shape index: {}]   ;;  %s789_s2 = inlined_call_operand.hbm [shape: f32[3,16,32], index: 2, kind: output, shape index: {}]  }
   0x1   :  { %8 = vsyncpa [#allocation6], 0 }
   0x2   :  { %10 = vsyncpa [#allocation6 + $0x1], 0 }
   0x3   :  { %11 = vsyncpa [#allocation4], 0 }
   0x4   :  { %13 = vsyncpa [#allocation4 + $0x1], 0  ;;  %s640_s9 = smov 0   ;;  %s642_s10 = smov 0  }
   0x5   :  { %s644_s11 = smov 0   ;;  %s646_s12 = smov 0  }
   0x6   :  { %s648_s13 = smov 0   ;;  %s650_s14 = smov 0  }
   0x7 LB: > { %s361_s15 = sadd.s32 4294967295, %s616_s14   ;;  %s362_s16 = sadd.s32 4294967294, %s616_s14   ;;  %s616_s14 = sphi %s650_s14, %s19_s14   ;;  %s612_s13 = sphi %s648_s13, %s801_s13   ;;  %s608_s12 = sphi %s646_s12, %s800_s12   ;;  %s604_s11 = sphi %s644_s11, %s799_s11   ;;  %s600_s10 = sphi %s642_s10, %s798_s10   ;;  %s596_s9 = sphi %s640_s9, %s797_s9  }
   0x8   : > { %p77_p0 = scmp.ne.s32.totalorder %s600_s10, %s596_s9  ;;  %p674_p1 = scmp.eq.s32.totalorder %s361_s15, 0 }
   0x9   : > { %p678_p2 = scmp.eq.s32.totalorder %s361_s15, 2  ;;  %p109_p3 = scmp.eq.s32.totalorder %s362_s16, 2 }
   0xa   : > { %p684_p4 = por %p674_p1, %p77_p0  ;;  %p363_p5 = scmp.ge.s32.totalorder %s616_s14, 1 }
   0xb   : > { %p689_p6 = por %p109_p3, %p77_p0  ;;  %p116_p7 = scmp.lt.s32.totalorder %s616_s14, 4 }
   0xc   : > { %s130_s23 = sshll.u32 %s787_s0, 4  ;;  %s618_s25 = smov [#allocation2]   ;;  %s131_s23 = int_to_ptr.hbm [resolvable:$true] %s130_s23 }
   0xd   : > { %p697_p8 = pnand %p363_p5, %p116_p7  ;;  %s132_s26 = sshll.u32 %s618_s25, 4  ;;  %s133_s26 = int_to_ptr.vmem [resolvable:$true] %s132_s26 }
   0xe   : > { %s619_s27 = smov 128   ;;  %s620_s28 = smov 8  }
   0xf   : > { %p399_p9 = pneg %p697_p8  ;;  %s28_s29 = sadd.s32 1, %s612_s13 }
  0x10   : > { %p29_p11 = scmp.ge.s32.totalorder %s28_s29, 3  ;;  %s64_s30 = sadd.s32 1, %s604_s11 }
  0x11   : > { %p400_p10 = pnand %p399_p9, %p674_p1  ;;  %p71_p12 = scmp.ne.s32.totalorder %s604_s11, %s600_s10 }
  0x12   : > { %p72_p13 = scmp.eq.s32.totalorder %s616_s14, 0  ;;  %s803_s29 = smov (%p29_p11, %s28_s29), 0 }
  0x13   : > { %402 = dma.hbm_to_vmem [thread:$0]  (!%p400_p10), %s131_s23, 256, %s133_s26, [#allocation3], %s619_s27, %s619_s27, %s620_s28  }
  0x14   : > { %p712_p0 = por %p72_p13, %p71_p12  ;;  %p718_p3 = por %p678_p2, %p71_p12 }
  0x15   : > { %s61_s5 = ssub.s32 %s612_s13, %s803_s29  ;;  %p412_p5 = scmp.lt.s32.totalorder %s616_s14, 3 }
  0x16   : > { %p62_p7 = scmp.eq.s32.totalorder %s61_s5, 0  ;;  %s146_s6 = sand.u32 1, %s604_s11  }
  0x17   : > { %s366_s7 = sshll.u32 %s146_s6, 4  ;;  %s387_s15 = sshll.u32 %s612_s13, 4 }
  0x18   : > { %s727_s8 = scalar_select %p62_p7, %s604_s11, %s64_s30  }
  0x19   : > { %s155_s22 = scalar_lea.hbm %s788_s1, %s387_s15  ;;  %s150_s23 = scalar_lea.vmem [#allocation5], %s366_s7 }
  0x1a   : > { %s158_s25 = sshll.u32 %s150_s23, 4  ;;  %s156_s18 = sshll.u32 %s155_s22, 4  ;;  %s159_s25 = int_to_ptr.vmem [resolvable:$true] %s158_s25  ;;  %s157_s18 = int_to_ptr.hbm [resolvable:$true] %s156_s18 }
  0x1b   : > { %p404_p2 = pnand %p412_p5, %p712_p0  ;;  %s147_s26 = scalar_lea.sflag [#allocation6], %s146_s6 }
  0x1c   : > { %s621_s27 = smov 64   ;;  %s622_s28 = smov 4  }
  0x1d   : > { %406 = dma.hbm_to_vmem [thread:$0]  (!%p404_p2), %s157_s18, 256, %s159_s25, %s147_s26, %s621_s27, %s621_s27, %s622_s28  }
  0x1e   : > { %170 = sbr.rel (%p697_p8) target bundleno = 186 (0xba), region = 28 }
  0x23   : > { %583 = dma.done.wait (%p674_p1), [#allocation3], 256  }
  0x24   : > { %585 = vsyncadd (%p674_p1), [#allocation3], 4294967040  ;;  %s742_s30 = sand.u32 1, %s600_s10  }
  0x25   : > { %s371_s3 = sshll.u32 %s742_s30, 4  ;;  %s178_s5 = scalar_lea.sflag [#allocation6], %s742_s30 }
  0x26   : > { %s181_s6 = scalar_lea.vmem [#allocation5], %s371_s3 }
  0x27   : > { %587 = dma.done.wait (%p684_p4), %s178_s5, 256  }
  0x28   : > { %589 = vsyncadd (%p684_p4), %s178_s5, 4294967040  ;;  %v389_v0 = vld [vmem:[%s181_s6 + $0x8] sm:$0xff]  ;;  %v388_v1 = vld [vmem:[%s181_s6] sm:$0xff]  ;;  %vm225_vm0 = vcmask 261120   ;;  %s390_s17 = sshll.u32 %s608_s12, 4  ;;  %s202_s19 = scalar_lea.vmem [#allocation7], %s371_s3 }
  0x29   : > { %235 = vmatpush.bf16.msra.mxu0 %v389_v0  ;;  %v206_v2 = vld [vmem:[#allocation2] sm:$0xff]  ;;  %v207_v3 = vld [vmem:[#allocation2 + $0x8] sm:$0xff]  ;;  %s259_s15 = scalar_lea.hbm %s789_s2, %s390_s17  ;;  %s260_s16 = sshll.u32 %s202_s19, 4  ;;  %s261_s16 = int_to_ptr.vmem [resolvable:$true] %s260_s16 }
  0x2a   : > { %v208_v4 = vpack.c.bf16 %v207_v3, %v206_v2  ;;  %s262_s21 = sshll.u32 %s259_s15, 4  ;;  %s246_s22 = scalar_lea.sflag [#allocation4], %s742_s30  ;;  %s263_s21 = int_to_ptr.hbm [resolvable:$true] %s262_s21 }
  0x2b   : > { %s544_s23 = sshra.s32 %s263_s21, 4  ;;  %s550_s26 = scalar_lea.hbm %s789_s2, 48  ;;  %s545_s23 = int_to_ptr.hbm [resolvable:$true] %s544_s23 }
  0x2c   : > { %s546_s25 = scalar_lea.hbm %s545_s23, 16  ;;  %p551_p9 = scmp.lt.s32.totalorder %s545_s23, %s789_s2 }
  0x2d   : > { %236 = vmatpush.bf16.msra.mxu0 %v388_v1  ;;  %p547_p1 = scmp.ne.s32.totalorder %s545_s23, %s546_s25  ;;  %p552_p10 = scmp.lt.s32.totalorder %s550_s26, %s546_s25 }
  0x2f   : > { %p548_p4 = pnand %p547_p1, %p718_p3  ;;  %p553_p11 = por %p552_p10, %p551_p9 }
  0x30   : > { %381 = vmatmul.msk.bf16.vlgmr.msra.gmra.mxu0 %vm225_vm0, %v208_v4 }
  0x31   : > { %p549_p8 = pneg %p548_p4 }
  0x33   : > { %p554_p12 = pnand %p553_p11, %p549_p8 }
  0xad   : > { %v238_v5 = vpop.f32.mrf.mxu0 }
  0xae   : > { %243 = vst.msk [vmem:[%s202_s19] sm:$0xff] %vm225_vm0, %v238_v5 }
  0xb5   : > { %v240_v6 = vpop.f32.mrf.mxu0 }
  0xb6   : > { %244 = vst.msk [vmem:[%s202_s19 + $0x8] sm:$0xff] %vm225_vm0, %v240_v6 }
  0xb7   : > { %557 = shalt.err (!%p554_p12)
}
  0xb8   : > { %s623_s30 = smov 128   ;;  %s624_s3 = smov 8  }
  0xb9   : > { %397 = dma.vmem_to_hbm [thread:$0]  (%p718_p3), %s261_s16, 256, %s263_s21, %s246_s22, %s623_s30, %s623_s30, %s624_s3  }
  0xba PF: > { %p414_p13 = scmp.ge.s32.totalorder %s616_s14, 2  ;;  %s277_s5 = sand.u32 1, %s596_s9  }
  0xbb   : > { %s278_s6 = scalar_lea.sflag [#allocation4], %s277_s5 }
  0xbc   : > { %p408_p0 = pnand %p414_p13, %p689_p6 }
  0xbe   : > { %p409_p5 = pneg %p408_p0 }
  0xc0   : > { %591 = dma.done.wait (%p409_p5), %s278_s6, 256  }
  0xc1   : > { %593 = vsyncadd (%p409_p5), %s278_s6, 4294967040  ;;  %s19_s14 = sadd.s32 1, %s616_s14   ;;  %s797_s9 = smov %s600_s10 }
  0xc2   : > { %p16_p7 = scmp.ge.s32.totalorder %s19_s14, 5   ;;  %s798_s10 = smov %s604_s11 }
  0xc3   : > { %s799_s11 = smov %s727_s8  ;;  %s800_s12 = smov %s612_s13 }
  0xc4   : > { %s801_s13 = smov %s803_s29  ;;  %18 = sbr.rel (!%p16_p7) target bundleno = 7 (0x7), region = 79 }
  0xc9   :  { %284 = vsyncpa [#allocation3], 1 }
  0xca   :  { %286 = vsyncpa [#allocation3 + $0x1], 1 }
  0xcb   :  { %287 = vsyncpa [#allocation6], 1 }
  0xcc   :  { %289 = vsyncpa [#allocation6 + $0x1], 1 }
  0xcd   :  { %290 = vsyncpa [#allocation4], 1 }
  0xce   :  { %292 = vsyncpa [#allocation4 + $0x1], 1 }

</bundles_post_ra>
